<compile_context>
chip_gen: v6e
topology: v6e:2x2x1
jax: 0.10.0
libtpu: 0.0.40
codegen_flags: <defaults>
</compile_context>

<pallas_src>
import jax
import jax.numpy as jnp
from jax import lax
from jax.experimental import pallas as pl
from jax.experimental.pallas import tpu as pltpu


def _make_kernel(H, W, C):
    HW = H * W

    def rolled(a, t):
        # shifted view for 3x3 tap t = kh*3 + kw : b[:, j] = a[:, j + s]
        # (wrap-around positions are zeroed by the boundary mask afterwards)
        kh, kw = t // 3, t % 3
        s = (kh - 1) * W + (kw - 1)
        if s == 0:
            return a
        return pltpu.roll(a, shift=(-s) % HW, axis=1)

    def kernel(x_ref, w1_ref, b1_ref, w2_ref, b2_ref, w3_ref, b3_ref,
               mask_ref, o_ref):

        def bottleneck(x, i):
            # conv1 (1x1) + bn1 + relu   (BN folded into w/b)
            h = jnp.maximum(
                jnp.dot(w1_ref[i], x, preferred_element_type=jnp.float32)
                + b1_ref[i], 0.0)

            # conv2 (3x3, pad=1) + bn2 + relu : one K=9*C matmul over stacked taps
            taps = jnp.concatenate([rolled(h, t) for t in range(9)], axis=0)
            taps = taps * mask_ref[...]                       # (9*C, HW)
            h = jnp.maximum(
                jnp.dot(w2_ref[i], taps, preferred_element_type=jnp.float32)
                + b2_ref[i], 0.0)

            # conv3 (1x1) + bn3, residual add (bypass = x), relu
            h = jnp.dot(w3_ref[i], h, preferred_element_type=jnp.float32) + b3_ref[i]
            return jnp.maximum(x + h, 0.0)

        x = x_ref[...]                                        # (C, HW)
        y = bottleneck(x, 0)                                  # res1
        o_ref[...] = bottleneck(y, 1)                         # res2

    return kernel


def _make_stacked_masks(H, W, C):
    """Dense (9*C, HW) boundary mask: rows [t*C:(t+1)*C] zero out positions where
    tap t would read across a row edge or outside the image."""
    HW = H * W
    idx = jnp.arange(HW)
    rows, cols = idx // W, idx % W
    ms = []
    for kh in range(3):
        for kw in range(3):
            dh, dw = kh - 1, kw - 1
            valid = ((rows + dh >= 0) & (rows + dh < H) &
                     (cols + dw >= 0) & (cols + dw < W))
            ms.append(jnp.broadcast_to(valid.astype(jnp.float32)[None, :], (C, HW)))
    return jnp.concatenate(ms, axis=0)                        # (9*C, HW)


def double_resnet(x, folded):
    """x: (N, C, H, W) float32 -> (N, C, H, W) float32 (DoubleResNet, stride=1)."""
    N, C, H, W = x.shape
    HW = H * W
    w1, b1, w2, b2, w3, b3 = folded
    masks = _make_stacked_masks(H, W, C)
    x_flat = x.reshape(N, C, HW)

    out = pl.pallas_call(
        _make_kernel(H, W, C),
        out_shape=jax.ShapeDtypeStruct((N, C, HW), jnp.float32),
        grid_spec=pltpu.PrefetchScalarGridSpec(
            num_scalar_prefetch=0,
            grid=(N,),
            in_specs=[
                pl.BlockSpec((None, C, HW), lambda n: (n, 0, 0)),      # x
                pl.BlockSpec((2, C, C), lambda n: (0, 0, 0)),          # w1 (res1,res2)
                pl.BlockSpec((2, C, 1), lambda n: (0, 0, 0)),          # b1
                pl.BlockSpec((2, C, 9 * C), lambda n: (0, 0, 0)),      # w2 stacked taps
                pl.BlockSpec((2, C, 1), lambda n: (0, 0, 0)),          # b2
                pl.BlockSpec((2, C, C), lambda n: (0, 0, 0)),          # w3
                pl.BlockSpec((2, C, 1), lambda n: (0, 0, 0)),          # b3
                pl.BlockSpec((9 * C, HW), lambda n: (0, 0)),           # boundary masks
            ],
            out_specs=pl.BlockSpec((None, C, HW), lambda n: (n, 0, 0)),
        ),
        compiler_params=pltpu.CompilerParams(
            dimension_semantics=("parallel",)),
    )(x_flat, w1, b1, w2, b2, w3, b3, masks)

    return out.reshape(N, C, H, W)


def init_params(key, C, eps=1e-5):
    """Random Bottleneck x2 params; returns (raw NCHW params, BN-folded kernel params)."""

    def make_block(k):
        ks = jax.random.split(k, 6)

        def conv_w(kk, shape, fan_in):
            return jax.random.normal(kk, shape, jnp.float32) * (1.0 / jnp.sqrt(fan_in))

        w1 = conv_w(ks[0], (C, C, 1, 1), C)          # Conv2d weight, OIHW
        w2 = conv_w(ks[1], (C, C, 3, 3), 9 * C)
        w3 = conv_w(ks[2], (C, C, 1, 1), C)

        def bn(kk):
            k1, k2, k3, k4 = jax.random.split(kk, 4)
            gamma = 1.0 + 0.1 * jax.random.normal(k1, (C,), jnp.float32)
            beta = 0.1 * jax.random.normal(k2, (C,), jnp.float32)
            mean = 0.1 * jax.random.normal(k3, (C,), jnp.float32)
            var = 0.5 + jax.random.uniform(k4, (C,), jnp.float32)
            scale = gamma / jnp.sqrt(var + eps)
            shift = beta - mean * scale
            return scale, shift

        bn1, bn2, bn3 = bn(ks[3]), bn(ks[4]), bn(ks[5])
        raw = dict(w1=w1, w2=w2, w3=w3, bn1=bn1, bn2=bn2, bn3=bn3)

        # fold eval-mode BN into conv weights/bias; pack 3x3 as (C, 9*C) with
        # column block t*C:(t+1)*C holding tap t = kh*3+kw.
        w1f = w1[:, :, 0, 0] * bn1[0][:, None]
        b1f = bn1[1][:, None]
        w2s = w2 * bn2[0][:, None, None, None]
        w2f = jnp.transpose(w2s, (0, 2, 3, 1)).reshape(C, 9 * C)
        b2f = bn2[1][:, None]
        w3f = w3[:, :, 0, 0] * bn3[0][:, None]
        b3f = bn3[1][:, None]
        return raw, (w1f, b1f, w2f, b2f, w3f, b3f)

    k1, k2 = jax.random.split(key)
    raw1, f1 = make_block(k1)
    raw2, f2 = make_block(k2)
    raw = dict(res1=raw1, res2=raw2)
    folded = tuple(jnp.stack([a, b], axis=0) for a, b in zip(f1, f2))
    return raw, folded


def reference(x, raw):
    """Pure-JAX NCHW reference of DoubleResNet.forward (eval-mode BN)."""
    dn = ('NCHW', 'OIHW', 'NCHW')

    def bn_apply(h, p):
        scale, shift = p
        return h * scale[None, :, None, None] + shift[None, :, None, None]

    def bottleneck(x, p):
        h = lax.conv_general_dilated(x, p['w1'], (1, 1), ((0, 0), (0, 0)),
                                     dimension_numbers=dn)
        h = jnp.maximum(bn_apply(h, p['bn1']), 0.0)
        h = lax.conv_general_dilated(h, p['w2'], (1, 1), ((1, 1), (1, 1)),
                                     dimension_numbers=dn)
        h = jnp.maximum(bn_apply(h, p['bn2']), 0.0)
        h = lax.conv_general_dilated(h, p['w3'], (1, 1), ((0, 0), (0, 0)),
                                     dimension_numbers=dn)
        h = bn_apply(h, p['bn3'])
        return jnp.maximum(x + h, 0.0)

    return bottleneck(bottleneck(x, raw['res1']), raw['res2'])


if __name__ == "__main__":
    N, C, H, W = 2, 8, 16, 16          # inplanes = planes = 8, stride = 1
    key = jax.random.PRNGKey(0)
    kx, kp = jax.random.split(key)
    x = jax.random.normal(kx, (N, C, H, W), jnp.float32)
    raw, folded = init_params(kp, C)

    out = double_resnet(x, folded)
    out = jax.block_until_ready(out)

    ref = reference(x, raw)
    assert out.shape == (N, C, H, W), out.shape
    err = float(jnp.max(jnp.abs(out - ref)))
    assert err < 2e-3, f"max abs error vs reference: {err}"
    print("KERNEL_OK")
</pallas_src>

<mosaic_0001>
module attributes {stable_mosaic.version = 11 : i64} {
  func.func @kernel(%arg0: i32, %arg1: memref<1x8x256xf32, #tpu.memory_space<vmem>>, %arg2: memref<2x8x8xf32, #tpu.memory_space<vmem>>, %arg3: memref<2x8x1xf32, #tpu.memory_space<vmem>>, %arg4: memref<2x8x72xf32, #tpu.memory_space<vmem>>, %arg5: memref<2x8x1xf32, #tpu.memory_space<vmem>>, %arg6: memref<2x8x8xf32, #tpu.memory_space<vmem>>, %arg7: memref<2x8x1xf32, #tpu.memory_space<vmem>>, %arg8: memref<72x256xf32, #tpu.memory_space<vmem>>, %arg9: memref<1x8x256xf32, #tpu.memory_space<vmem>>) attributes {dimension_semantics = [#tpu.dimension_semantics<parallel>], iteration_bounds = array<i64: 2>, scalar_prefetch = 0 : i64, scratch_operands = 0 : i64, tpu.core_type = #tpu.core_type<tc>, window_params = [{transform_indices = @transform_0, window_bounds = array<i64: 1, 8, 256>}, {pipeline_mode = #tpu.pipeline_mode<synchronous>, transform_indices = @transform_1, window_bounds = array<i64: 2, 8, 8>}, {pipeline_mode = #tpu.pipeline_mode<synchronous>, transform_indices = @transform_2, window_bounds = array<i64: 2, 8, 1>}, {pipeline_mode = #tpu.pipeline_mode<synchronous>, transform_indices = @transform_3, window_bounds = array<i64: 2, 8, 72>}, {pipeline_mode = #tpu.pipeline_mode<synchronous>, transform_indices = @transform_4, window_bounds = array<i64: 2, 8, 1>}, {pipeline_mode = #tpu.pipeline_mode<synchronous>, transform_indices = @transform_5, window_bounds = array<i64: 2, 8, 8>}, {pipeline_mode = #tpu.pipeline_mode<synchronous>, transform_indices = @transform_6, window_bounds = array<i64: 2, 8, 1>}, {pipeline_mode = #tpu.pipeline_mode<synchronous>, transform_indices = @transform_7, window_bounds = array<i64: 72, 256>}, {transform_indices = @transform_8, window_bounds = array<i64: 1, 8, 256>}]} {
    %c0 = arith.constant 0 : index
    %c0_0 = arith.constant 0 : index
    %c0_1 = arith.constant 0 : index
    %0 = vector.load %arg1[%c0, %c0_0, %c0_1] : memref<1x8x256xf32, #tpu.memory_space<vmem>>, vector<1x8x256xf32>
    %1 = vector.shape_cast %0 : vector<1x8x256xf32> to vector<8x256xf32>
    %c0_2 = arith.constant 0 : index
    %c0_3 = arith.constant 0 : index
    %c0_4 = arith.constant 0 : index
    %2 = vector.load %arg2[%c0_2, %c0_3, %c0_4] : memref<2x8x8xf32, #tpu.memory_space<vmem>>, vector<1x8x8xf32>
    %3 = vector.shape_cast %2 : vector<1x8x8xf32> to vector<8x8xf32>
    %cst = arith.constant dense<0.000000e+00> : vector<8x256xf32>
    %4 = tpu.matmul %3, %1, %cst {dimension_numbers = #tpu.dot_dimension_numbers<[1], [0], [0], [1], [0, 0, 1, 1], [], []>} : vector<8x8xf32>, vector<8x256xf32>, vector<8x256xf32> -> vector<8x256xf32>
    %c0_5 = arith.constant 0 : index
    %c0_6 = arith.constant 0 : index
    %c0_7 = arith.constant 0 : index
    %5 = vector.load %arg3[%c0_5, %c0_6, %c0_7] : memref<2x8x1xf32, #tpu.memory_space<vmem>>, vector<1x8x1xf32>
    %6 = vector.shape_cast %5 : vector<1x8x1xf32> to vector<8x1xf32>
    %7 = vector.broadcast %6 : vector<8x1xf32> to vector<8x256xf32>
    %8 = arith.addf %4, %7 : vector<8x256xf32>
    %cst_8 = arith.constant 0.000000e+00 : f32
    %9 = vector.broadcast %cst_8 : f32 to vector<8x256xf32>
    %10 = arith.maximumf %8, %9 : vector<8x256xf32>
    %c17_i32 = arith.constant 17 : i32
    %11 = tpu.dynamic_rotate %10 by %c17_i32 dim 1 : vector<8x256xf32>, i32 -> vector<8x256xf32>
    %c16_i32 = arith.constant 16 : i32
    %12 = tpu.dynamic_rotate %10 by %c16_i32 dim 1 : vector<8x256xf32>, i32 -> vector<8x256xf32>
    %c15_i32 = arith.constant 15 : i32
    %13 = tpu.dynamic_rotate %10 by %c15_i32 dim 1 : vector<8x256xf32>, i32 -> vector<8x256xf32>
    %c1_i32 = arith.constant 1 : i32
    %14 = tpu.dynamic_rotate %10 by %c1_i32 dim 1 : vector<8x256xf32>, i32 -> vector<8x256xf32>
    %c255_i32 = arith.constant 255 : i32
    %15 = tpu.dynamic_rotate %10 by %c255_i32 dim 1 : vector<8x256xf32>, i32 -> vector<8x256xf32>
    %c241_i32 = arith.constant 241 : i32
    %16 = tpu.dynamic_rotate %10 by %c241_i32 dim 1 : vector<8x256xf32>, i32 -> vector<8x256xf32>
    %c240_i32 = arith.constant 240 : i32
    %17 = tpu.dynamic_rotate %10 by %c240_i32 dim 1 : vector<8x256xf32>, i32 -> vector<8x256xf32>
    %c239_i32 = arith.constant 239 : i32
    %18 = tpu.dynamic_rotate %10 by %c239_i32 dim 1 : vector<8x256xf32>, i32 -> vector<8x256xf32>
    %19 = tpu.concatenate %11, %12, %13, %14, %10, %15, %16, %17, %18 in 0 : vector<8x256xf32>, vector<8x256xf32>, vector<8x256xf32>, vector<8x256xf32>, vector<8x256xf32>, vector<8x256xf32>, vector<8x256xf32>, vector<8x256xf32>, vector<8x256xf32> -> vector<72x256xf32>
    %c0_9 = arith.constant 0 : index
    %c0_10 = arith.constant 0 : index
    %20 = vector.load %arg8[%c0_9, %c0_10] : memref<72x256xf32, #tpu.memory_space<vmem>>, vector<72x256xf32>
    %21 = arith.mulf %19, %20 : vector<72x256xf32>
    %c0_11 = arith.constant 0 : index
    %c0_12 = arith.constant 0 : index
    %c0_13 = arith.constant 0 : index
    %22 = vector.load %arg4[%c0_11, %c0_12, %c0_13] : memref<2x8x72xf32, #tpu.memory_space<vmem>>, vector<1x8x72xf32>
    %23 = vector.shape_cast %22 : vector<1x8x72xf32> to vector<8x72xf32>
    %cst_14 = arith.constant dense<0.000000e+00> : vector<8x256xf32>
    %24 = tpu.matmul %23, %21, %cst_14 {dimension_numbers = #tpu.dot_dimension_numbers<[1], [0], [0], [1], [0, 0, 1, 1], [], []>} : vector<8x72xf32>, vector<72x256xf32>, vector<8x256xf32> -> vector<8x256xf32>
    %c0_15 = arith.constant 0 : index
    %c0_16 = arith.constant 0 : index
    %c0_17 = arith.constant 0 : index
    %25 = vector.load %arg5[%c0_15, %c0_16, %c0_17] : memref<2x8x1xf32, #tpu.memory_space<vmem>>, vector<1x8x1xf32>
    %26 = vector.shape_cast %25 : vector<1x8x1xf32> to vector<8x1xf32>
    %27 = vector.broadcast %26 : vector<8x1xf32> to vector<8x256xf32>
    %28 = arith.addf %24, %27 : vector<8x256xf32>
    %cst_18 = arith.constant 0.000000e+00 : f32
    %29 = vector.broadcast %cst_18 : f32 to vector<8x256xf32>
    %30 = arith.maximumf %28, %29 : vector<8x256xf32>
    %c0_19 = arith.constant 0 : index
    %c0_20 = arith.constant 0 : index
    %c0_21 = arith.constant 0 : index
    %31 = vector.load %arg6[%c0_19, %c0_20, %c0_21] : memref<2x8x8xf32, #tpu.memory_space<vmem>>, vector<1x8x8xf32>
    %32 = vector.shape_cast %31 : vector<1x8x8xf32> to vector<8x8xf32>
    %cst_22 = arith.constant dense<0.000000e+00> : vector<8x256xf32>
    %33 = tpu.matmul %32, %30, %cst_22 {dimension_numbers = #tpu.dot_dimension_numbers<[1], [0], [0], [1], [0, 0, 1, 1], [], []>} : vector<8x8xf32>, vector<8x256xf32>, vector<8x256xf32> -> vector<8x256xf32>
    %c0_23 = arith.constant 0 : index
    %c0_24 = arith.constant 0 : index
    %c0_25 = arith.constant 0 : index
    %34 = vector.load %arg7[%c0_23, %c0_24, %c0_25] : memref<2x8x1xf32, #tpu.memory_space<vmem>>, vector<1x8x1xf32>
    %35 = vector.shape_cast %34 : vector<1x8x1xf32> to vector<8x1xf32>
    %36 = vector.broadcast %35 : vector<8x1xf32> to vector<8x256xf32>
    %37 = arith.addf %33, %36 : vector<8x256xf32>
    %38 = arith.addf %1, %37 : vector<8x256xf32>
    %cst_26 = arith.constant 0.000000e+00 : f32
    %39 = vector.broadcast %cst_26 : f32 to vector<8x256xf32>
    %40 = arith.maximumf %38, %39 : vector<8x256xf32>
    %c1 = arith.constant 1 : index
    %c0_27 = arith.constant 0 : index
    %c0_28 = arith.constant 0 : index
    %41 = vector.load %arg2[%c1, %c0_27, %c0_28] : memref<2x8x8xf32, #tpu.memory_space<vmem>>, vector<1x8x8xf32>
    %42 = vector.shape_cast %41 : vector<1x8x8xf32> to vector<8x8xf32>
    %cst_29 = arith.constant dense<0.000000e+00> : vector<8x256xf32>
    %43 = tpu.matmul %42, %40, %cst_29 {dimension_numbers = #tpu.dot_dimension_numbers<[1], [0], [0], [1], [0, 0, 1, 1], [], []>} : vector<8x8xf32>, vector<8x256xf32>, vector<8x256xf32> -> vector<8x256xf32>
    %c1_30 = arith.constant 1 : index
    %c0_31 = arith.constant 0 : index
    %c0_32 = arith.constant 0 : index
    %44 = vector.load %arg3[%c1_30, %c0_31, %c0_32] : memref<2x8x1xf32, #tpu.memory_space<vmem>>, vector<1x8x1xf32>
    %45 = vector.shape_cast %44 : vector<1x8x1xf32> to vector<8x1xf32>
    %46 = vector.broadcast %45 : vector<8x1xf32> to vector<8x256xf32>
    %47 = arith.addf %43, %46 : vector<8x256xf32>
    %cst_33 = arith.constant 0.000000e+00 : f32
    %48 = vector.broadcast %cst_33 : f32 to vector<8x256xf32>
    %49 = arith.maximumf %47, %48 : vector<8x256xf32>
    %c17_i32_34 = arith.constant 17 : i32
    %50 = tpu.dynamic_rotate %49 by %c17_i32_34 dim 1 : vector<8x256xf32>, i32 -> vector<8x256xf32>
    %c16_i32_35 = arith.constant 16 : i32
    %51 = tpu.dynamic_rotate %49 by %c16_i32_35 dim 1 : vector<8x256xf32>, i32 -> vector<8x256xf32>
    %c15_i32_36 = arith.constant 15 : i32
    %52 = tpu.dynamic_rotate %49 by %c15_i32_36 dim 1 : vector<8x256xf32>, i32 -> vector<8x256xf32>
    %c1_i32_37 = arith.constant 1 : i32
    %53 = tpu.dynamic_rotate %49 by %c1_i32_37 dim 1 : vector<8x256xf32>, i32 -> vector<8x256xf32>
    %c255_i32_38 = arith.constant 255 : i32
    %54 = tpu.dynamic_rotate %49 by %c255_i32_38 dim 1 : vector<8x256xf32>, i32 -> vector<8x256xf32>
    %c241_i32_39 = arith.constant 241 : i32
    %55 = tpu.dynamic_rotate %49 by %c241_i32_39 dim 1 : vector<8x256xf32>, i32 -> vector<8x256xf32>
    %c240_i32_40 = arith.constant 240 : i32
    %56 = tpu.dynamic_rotate %49 by %c240_i32_40 dim 1 : vector<8x256xf32>, i32 -> vector<8x256xf32>
    %c239_i32_41 = arith.constant 239 : i32
    %57 = tpu.dynamic_rotate %49 by %c239_i32_41 dim 1 : vector<8x256xf32>, i32 -> vector<8x256xf32>
    %58 = tpu.concatenate %50, %51, %52, %53, %49, %54, %55, %56, %57 in 0 : vector<8x256xf32>, vector<8x256xf32>, vector<8x256xf32>, vector<8x256xf32>, vector<8x256xf32>, vector<8x256xf32>, vector<8x256xf32>, vector<8x256xf32>, vector<8x256xf32> -> vector<72x256xf32>
    %c0_42 = arith.constant 0 : index
    %c0_43 = arith.constant 0 : index
    %59 = vector.load %arg8[%c0_42, %c0_43] : memref<72x256xf32, #tpu.memory_space<vmem>>, vector<72x256xf32>
    %60 = arith.mulf %58, %59 : vector<72x256xf32>
    %c1_44 = arith.constant 1 : index
    %c0_45 = arith.constant 0 : index
    %c0_46 = arith.constant 0 : index
    %61 = vector.load %arg4[%c1_44, %c0_45, %c0_46] : memref<2x8x72xf32, #tpu.memory_space<vmem>>, vector<1x8x72xf32>
    %62 = vector.shape_cast %61 : vector<1x8x72xf32> to vector<8x72xf32>
    %cst_47 = arith.constant dense<0.000000e+00> : vector<8x256xf32>
    %63 = tpu.matmul %62, %60, %cst_47 {dimension_numbers = #tpu.dot_dimension_numbers<[1], [0], [0], [1], [0, 0, 1, 1], [], []>} : vector<8x72xf32>, vector<72x256xf32>, vector<8x256xf32> -> vector<8x256xf32>
    %c1_48 = arith.constant 1 : index
    %c0_49 = arith.constant 0 : index
    %c0_50 = arith.constant 0 : index
    %64 = vector.load %arg5[%c1_48, %c0_49, %c0_50] : memref<2x8x1xf32, #tpu.memory_space<vmem>>, vector<1x8x1xf32>
    %65 = vector.shape_cast %64 : vector<1x8x1xf32> to vector<8x1xf32>
    %66 = vector.broadcast %65 : vector<8x1xf32> to vector<8x256xf32>
    %67 = arith.addf %63, %66 : vector<8x256xf32>
    %cst_51 = arith.constant 0.000000e+00 : f32
    %68 = vector.broadcast %cst_51 : f32 to vector<8x256xf32>
    %69 = arith.maximumf %67, %68 : vector<8x256xf32>
    %c1_52 = arith.constant 1 : index
    %c0_53 = arith.constant 0 : index
    %c0_54 = arith.constant 0 : index
    %70 = vector.load %arg6[%c1_52, %c0_53, %c0_54] : memref<2x8x8xf32, #tpu.memory_space<vmem>>, vector<1x8x8xf32>
    %71 = vector.shape_cast %70 : vector<1x8x8xf32> to vector<8x8xf32>
    %cst_55 = arith.constant dense<0.000000e+00> : vector<8x256xf32>
    %72 = tpu.matmul %71, %69, %cst_55 {dimension_numbers = #tpu.dot_dimension_numbers<[1], [0], [0], [1], [0, 0, 1, 1], [], []>} : vector<8x8xf32>, vector<8x256xf32>, vector<8x256xf32> -> vector<8x256xf32>
    %c1_56 = arith.constant 1 : index
    %c0_57 = arith.constant 0 : index
    %c0_58 = arith.constant 0 : index
    %73 = vector.load %arg7[%c1_56, %c0_57, %c0_58] : memref<2x8x1xf32, #tpu.memory_space<vmem>>, vector<1x8x1xf32>
    %74 = vector.shape_cast %73 : vector<1x8x1xf32> to vector<8x1xf32>
    %75 = vector.broadcast %74 : vector<8x1xf32> to vector<8x256xf32>
    %76 = arith.addf %72, %75 : vector<8x256xf32>
    %77 = arith.addf %40, %76 : vector<8x256xf32>
    %cst_59 = arith.constant 0.000000e+00 : f32
    %78 = vector.broadcast %cst_59 : f32 to vector<8x256xf32>
    %79 = arith.maximumf %77, %78 : vector<8x256xf32>
    %c0_60 = arith.constant 0 : index
    %c0_61 = arith.constant 0 : index
    %c0_62 = arith.constant 0 : index
    %80 = vector.load %arg9[%c0_60, %c0_61, %c0_62] : memref<1x8x256xf32, #tpu.memory_space<vmem>>, vector<1x8x256xf32>
    %81 = vector.shape_cast %80 : vector<1x8x256xf32> to vector<8x256xf32>
    %82 = vector.shape_cast %79 : vector<8x256xf32> to vector<1x8x256xf32>
    tpu.vector_store %arg9[%c0_60, %c0_61, %c0_62], %82 {strides = array<i32>} : memref<1x8x256xf32, #tpu.memory_space<vmem>>, vector<1x8x256xf32>,
    return
  }
  func.func @transform_0(%arg0: i32) -> (i32, i32, i32) {
    %c0_i32 = arith.constant 0 : i32
    %c0_i32_0 = arith.constant 0 : i32
    %c0_i32_1 = arith.constant 0 : i32
    return %arg0, %c0_i32, %c0_i32_0 : i32, i32, i32
  }
  func.func @transform_1(%arg0: i32) -> (i32, i32, i32) {
    %c0_i32 = arith.constant 0 : i32
    %c0_i32_0 = arith.constant 0 : i32
    %c0_i32_1 = arith.constant 0 : i32
    %c0_i32_2 = arith.constant 0 : i32
    return %c0_i32, %c0_i32_0, %c0_i32_1 : i32, i32, i32
  }
  func.func @transform_2(%arg0: i32) -> (i32, i32, i32) {
    %c0_i32 = arith.constant 0 : i32
    %c0_i32_0 = arith.constant 0 : i32
    %c0_i32_1 = arith.constant 0 : i32
    %c0_i32_2 = arith.constant 0 : i32
    return %c0_i32, %c0_i32_0, %c0_i32_1 : i32, i32, i32
  }
  func.func @transform_3(%arg0: i32) -> (i32, i32, i32) {
    %c0_i32 = arith.constant 0 : i32
    %c0_i32_0 = arith.constant 0 : i32
    %c0_i32_1 = arith.constant 0 : i32
    %c0_i32_2 = arith.constant 0 : i32
    return %c0_i32, %c0_i32_0, %c0_i32_1 : i32, i32, i32
  }
  func.func @transform_4(%arg0: i32) -> (i32, i32, i32) {
    %c0_i32 = arith.constant 0 : i32
    %c0_i32_0 = arith.constant 0 : i32
    %c0_i32_1 = arith.constant 0 : i32
    %c0_i32_2 = arith.constant 0 : i32
    return %c0_i32, %c0_i32_0, %c0_i32_1 : i32, i32, i32
  }
  func.func @transform_5(%arg0: i32) -> (i32, i32, i32) {
    %c0_i32 = arith.constant 0 : i32
    %c0_i32_0 = arith.constant 0 : i32
    %c0_i32_1 = arith.constant 0 : i32
    %c0_i32_2 = arith.constant 0 : i32
    return %c0_i32, %c0_i32_0, %c0_i32_1 : i32, i32, i32
  }
  func.func @transform_6(%arg0: i32) -> (i32, i32, i32) {
    %c0_i32 = arith.constant 0 : i32
    %c0_i32_0 = arith.constant 0 : i32
    %c0_i32_1 = arith.constant 0 : i32
    %c0_i32_2 = arith.constant 0 : i32
    return %c0_i32, %c0_i32_0, %c0_i32_1 : i32, i32, i32
  }
  func.func @transform_7(%arg0: i32) -> (i32, i32) {
    %c0_i32 = arith.constant 0 : i32
    %c0_i32_0 = arith.constant 0 : i32
    %c0_i32_1 = arith.constant 0 : i32
    return %c0_i32, %c0_i32_0 : i32, i32
  }
  func.func @transform_8(%arg0: i32) -> (i32, i32, i32) {
    %c0_i32 = arith.constant 0 : i32
    %c0_i32_0 = arith.constant 0 : i32
    %c0_i32_1 = arith.constant 0 : i32
    return %arg0, %c0_i32, %c0_i32_0 : i32, i32, i32
  }
}

</mosaic_0001>

<bundles_post_ra>
// kernel: tpu_custom_call.1
= control target key start
LH: loop header
LB: loop body
LE: loop exit
PB: predicated region body
PF: predicated region fallthrough
CT: control target
= control target key end

     0   :  { %13 = vsyncpa [#allocation3], 0  ;;  %s1848_s0 = inlined_call_operand.vmem [shape: f32[2,8,256], index: 0, kind: input, shape index: {}]   ;;  %s1849_s1 = inlined_call_operand.vmem [shape: f32[2,8,8], index: 1, kind: input, shape index: {}]   ;;  %s1850_s2 = inlined_call_operand.vmem [shape: f32[2,8,1], index: 2, kind: input, shape index: {}]   ;;  %s1851_s3 = inlined_call_operand.hbm [shape: f32[2,8,72], index: 3, kind: input, shape index: {}]   ;;  %s1852_s4 = inlined_call_operand.vmem [shape: f32[2,8,1], index: 4, kind: input, shape index: {}]   ;;  %s1853_s5 = inlined_call_operand.hbm [shape: f32[2,8,8], index: 5, kind: input, shape index: {}]   ;;  %s1854_s6 = inlined_call_operand.vmem [shape: f32[2,8,1], index: 6, kind: input, shape index: {}]   ;;  %s1855_s7 = inlined_call_operand.hbm [shape: f32[72,256], index: 7, kind: input, shape index: {}]   ;;  %s1856_s8 = inlined_call_operand.hbm [shape: f32[2,8,256], index: 8, kind: output, shape index: {}]  }
   0x1   :  { %14 = vsyncpa [#allocation6], 0 }
   0x2   :  { %15 = vsyncpa [#allocation4], 0 }
   0x3   :  { %17 = vsyncpa [#allocation4 + $0x1], 0  ;;  %s1454_s27 = smov 0   ;;  %s1456_s28 = smov 0  }
   0x4   :  { %s1458_s29 = smov 0   ;;  %s1460_s30 = smov 0  }
   0x5 LB: > { %s1475_s9 = sadd.s32 4294967295, %s1389_s30   ;;  %s1127_s10 = sadd.s32 4294967294, %s1389_s30   ;;  %s1389_s30 = sphi %s1460_s30, %s1875_s30   ;;  %s1385_s29 = sphi %s1458_s29, %s1874_s29   ;;  %s1381_s28 = sphi %s1456_s28, %s1873_s28   ;;  %s1377_s27 = sphi %s1454_s27, %s1872_s27  }
   0x6   : > { %s1479_s11 = sadd.s32 1, %s1389_s30   ;;  %s203_s12 = sadd.s32 1, %s1385_s29 }
   0x7   : > { %s200_s13 = ssub.s32 %s1389_s30, %s1479_s11  ;;  %p213_p0 = scmp.ne.s32.totalorder %s1385_s29, %s1381_s28 }
   0x8   : > { %p201_p1 = scmp.eq.s32.totalorder %s200_s13, 0  ;;  %p214_p2 = scmp.eq.s32.totalorder %s1475_s9, 1 }
   0x9   : > { %p219_p3 = scmp.ne.s32.totalorder %s1381_s28, %s1377_s27  ;;  %p220_p4 = scmp.eq.s32.totalorder %s1127_s10, 1 }
   0xa   : > { %s1490_s14 = scalar_select %p201_p1, %s1385_s29, %s203_s12  }
   0xb   : > { %p1492_p5 = por %p214_p2, %p213_p0  ;;  %p1496_p6 = por %p220_p4, %p219_p3 }
   0xc   : > { %p1128_p7 = scmp.ge.s32.totalorder %s1389_s30, 1  ;;  %p227_p8 = scmp.lt.s32.totalorder %s1389_s30, 3 }
   0xd   : > { %s1861_s15 = scalar_select %p1492_p5, 1, 0 }
   0xe   : > { %s1862_s16 = scalar_select %p1496_p6, 1, 0 }
   0xf   : > { %p1857_p9 = scmp.eq.s32.totalorder %s1475_s9, 0  ;;  %p1503_p10 = pnand %p1128_p7, %p227_p8 }
  0x10   : > { %s1391_s18 = smov [#allocation5]   ;;  %s1392_s21 = smov [#allocation2]  }
  0x11   : > { %p1171_p11 = pneg %p1503_p10  ;;  %s261_s19 = sshll.u32 %s1391_s18, 4  ;;  %s262_s19 = int_to_ptr.vmem [resolvable:$true] %s261_s19 }
  0x12   : > { %s245_s22 = sshll.u32 %s1392_s21, 4  ;;  %s1393_s23 = smov [#allocation7]   ;;  %s246_s22 = int_to_ptr.vmem [resolvable:$true] %s245_s22 }
  0x13   : > { %p1511_p12 = pnand %p1857_p9, %p1171_p11  ;;  %s277_s24 = sshll.u32 %s1393_s23, 4  ;;  %s278_s24 = int_to_ptr.vmem [resolvable:$true] %s277_s24 }
  0x14   : > { %s1254_s25 = scalar_lea.vmem %s262_s19, 256  ;;  %p1262_p3 = scmp.lt.s32.totalorder %s262_s19, %s262_s19 }
  0x15   : > { %p1245_p13 = pneg %p1511_p12  ;;  %p1255_p0 = scmp.ne.s32.totalorder %s262_s19, %s1254_s25 }
  0x16   : > { %p1263_p4 = scmp.lt.s32.totalorder %s1254_s25, %s1254_s25 }
  0x17   : > { %p1257_p1 = pnand %p1255_p0, %p1245_p13 }
  0x18   : > { %p1264_p7 = por %p1263_p4, %p1262_p3 }
  0x19   : > { %p1258_p2 = pneg %p1257_p1 }
  0x1b   : > { %p1265_p8 = pnand %p1264_p7, %p1258_p2 }
  0x1d   : > { %1268 = shalt.err (!%p1265_p8)
}
  0x1e   : > { %s1394_s26 = smov 128   ;;  %s1395_s10 = smov 8  }
  0x1f   : > { %1177 = dma.hbm_to_vmem [thread:$0]  (!%p1511_p12), %s1853_s5, 256, %s262_s19, [#allocation6], %s1394_s26, %s1394_s26, %s1395_s10  }
  0x20   : > { %s1280_s18 = scalar_lea.vmem %s246_s22, 256  ;;  %p1288_p9 = scmp.lt.s32.totalorder %s246_s22, %s246_s22 }
  0x21   : > { %p1281_p11 = scmp.ne.s32.totalorder %s246_s22, %s1280_s18  ;;  %p1289_p6 = scmp.lt.s32.totalorder %s1280_s18, %s1280_s18 }
  0x23   : > { %p1283_p0 = pnand %p1281_p11, %p1245_p13  ;;  %p1290_p3 = por %p1289_p6, %p1288_p9 }
  0x25   : > { %p1284_p1 = pneg %p1283_p0 }
  0x27   : > { %p1291_p2 = pnand %p1290_p3, %p1284_p1 }
  0x29   : > { %1294 = shalt.err (!%p1291_p2)
}
  0x2a   : > { %1174 = dma.hbm_to_vmem [thread:$0]  (!%p1511_p12), %s1851_s3, 256, %s246_s22, [#allocation3], %s1394_s26, %s1394_s26, %s1395_s10  }
  0x2b   : > { %s1306_s19 = scalar_lea.vmem %s278_s24, 2304  ;;  %p1314_p11 = scmp.lt.s32.totalorder %s278_s24, %s278_s24 }
  0x2c   : > { %p1307_p4 = scmp.ne.s32.totalorder %s278_s24, %s1306_s19  ;;  %p1315_p0 = scmp.lt.s32.totalorder %s1306_s19, %s1306_s19 }
  0x2e   : > { %p1309_p7 = pnand %p1307_p4, %p1245_p13  ;;  %p1316_p5 = por %p1315_p0, %p1314_p11 }
  0x30   : > { %p1310_p8 = pneg %p1309_p7 }
  0x32   : > { %p1317_p6 = pnand %p1316_p5, %p1310_p8 }
  0x34   : > { %1320 = shalt.err (!%p1317_p6)
}
  0x35   : > { %s1396_s25 = smov 256   ;;  %s1397_s12 = smov 16  }
  0x36   : > { %1180 = dma.hbm_to_vmem [thread:$0]  (!%p1511_p12), %s1855_s7, 2304, %s278_s24, [#allocation6], %s1396_s25, %s1396_s25, %s1397_s12  }
  0x37   : > { %301 = sbr.rel (%p1503_p10) target bundleno = 1584 (0x630), region = 52  ;;  %p1865_p9 = scmp.eq.s32.totalorder (!%p1503_p10), %s1475_s9, 0 }
  0x3c   : > { %1364 = dma.done.wait (%p1865_p9), [#allocation3], 256   ;;  %p1866_p13 = pmov %p1865_p9 }
  0x3d   : > { %p1867_p5 = pmov %p1865_p9 }
  0x3e   : > { %1366 = vsyncadd (%p1866_p13), [#allocation3], 4294967040 }
  0x3f   : > { %1368 = dma.done.wait (%p1867_p5), [#allocation6], 2560   ;;  %p1868_p1 = pmov %p1867_p5 }
  0x40   : > { %p343_p3 = scmp.lt.s32.totalorder %s1475_s9, 1  ;;  %v1398_v0 = vmov 0.0   ;;  %v1399_v1 = vmov 0   ;;  %v350_v4 = vld [vmem:[%s1849_s1] sm:$0xff]  ;;  %vm357_vm0 = vcmask 64512   ;;  %s1400_s25 = smov 112   ;;  %v438_v18 = vlaneseq }
  0x41   : > { %1370 = vsyncadd (%p1868_p1), [#allocation6], 4294964736  ;;  %425 = vmatprep.mubr.f32.mxu1 %v1398_v0  ;;  %1241 = vset.pattern.permute.xlu0 %v1399_v1  ;;  %v351_v5 = vld [vmem:[%s1850_s2] sm:$0xff]  ;;  %s1401_s12 = smov 111   ;;  %s1402_s13 = smov 113   ;;  %v1144_v15 = vld [vmem:[%s1850_s2 + $0x8] sm:$0xff] }
  0x42   : > { %s344_s17 = scalar_select %p343_p3, %s1475_s9, 1  ;;  %1242 = vset.pattern.permute.xlu1 %v1399_v1  ;;  %686 = vmatprep.mubr.f32.mxu0 %v1398_v0  ;;  %v613_v13 = vld [vmem:[%s1854_s6] sm:$0xff]  ;;  %v1617_v21 = vand.u32 127, %v438_v18  ;;  %v1623_v25 = vld [vmem:[#allocation7 + $0x88] sm:$0xff]  ;;  %v1626_v28 = vld [vmem:[#allocation7 + $0x78] sm:$0xff]  ;;  %vm535_vm9 = vcmask 588800  }
  0x43   : > { %354 = vperm.xlu0 %1241, %v351_v5   ;;  %s1403_s18 = smov 127   ;;  %s1406_s22 = smov 16   ;;  %v529_v14 = vld [vmem:[%s1852_s4] sm:$0xff]  ;;  %v1634_v32 = vld [vmem:[#allocation7 + $0x70] sm:$0xff]  ;;  %v1641_v36 = vld [vmem:[#allocation7 + $0x68] sm:$0xff] }
  0x44   : > { %s1155_s20 = sshll.u32 %s344_s17, 4  ;;  %s1404_s17 = smov 1   ;;  %vm482_vm1 = vcmp.lt.s32.totalorder %v1617_v21, 112  ;;  %vm489_vm2 = vcmp.lt.s32.totalorder %v1617_v21, 111  ;;  %v1621_v24 = vld [vmem:[#allocation7 + $0x80] sm:$0xff]  ;;  %vm475_vm3 = vcmp.lt.s32.totalorder %v1617_v21, 113 }
  0x45   : > { %s347_s26 = scalar_lea.vmem %s1848_s0, %s1155_s20  ;;  %s1859_s20 = smov 15   ;;  %vm468_vm4 = vcmp.lt.s32.totalorder %v1617_v21, 127  ;;  %v1646_v39 = vld [vmem:[#allocation7 + $0x60] sm:$0xff]  ;;  %v1651_v44 = vld [vmem:[#allocation7 + $0x58] sm:$0xff]  ;;  %v1656_v47 = vld [vmem:[#allocation7 + $0x50] sm:$0xff]  ;;  %vm461_vm5 = vcmp.lt.s32.totalorder %v1617_v21, 1 }
  0x46   : > { %v1558_v2 = vld [vmem:[%s347_s26 + $0x8] sm:$0xff]  ;;  %v1560_v3 = vld [vmem:[%s347_s26] sm:$0xff]  ;;  %s1407_s24 = smov 17   ;;  %vm454_vm6 = vcmp.lt.s32.totalorder %v1617_v21, 15  ;;  %v1669_v56 = vld [vmem:[#allocation7 + $0x38] sm:$0xff]  ;;  %vm447_vm7 = vcmp.lt.s32.totalorder %v1617_v21, 16 }
  0x47   : > { %391 = vmatprep.subr.mxu1 %v1558_v2  ;;  %v1662_v50 = vld [vmem:[#allocation7 + $0x48] sm:$0xff]  ;;  %v1666_v54 = vld [vmem:[#allocation7 + $0x40] sm:$0xff]  ;;  %v1673_v58 = vld [vmem:[#allocation7 + $0x30] sm:$0xff]  ;;  %vm440_vm8 = vcmp.lt.s32.totalorder %v1617_v21, 17  ;;  %s1869_s10 = smov 15   ;;  %p1870_p12 = scmp.ne.s32.totalorder %s1861_s15, 0 }
  0x48   : > { %392 = vmatpush1.msra.mxu1 %v1560_v3  ;;  %v1680_v61 = vld [vmem:[#allocation7 + $0x28] sm:$0xff] }
  0x49   : > { %1140 = vmatmul.mubr.msk.f32.vlgmr.msra.gmra.mxu1 %vm357_vm0, %v350_v4  ;;  %v1687_v4 = vld [vmem:[#allocation7 + $0x20] sm:$0xff] }
  0x4a   : > { %603 = vmatprep.mubr.f32.mxu1 %v1398_v0 }
  0xbe   : > { %v355_v6 = vpop.permute.xlu0 %354 }
 0x109   : > { %v427_v7 = vpop.f32.mrf.mxu1 }
 0x10a   : > { %v428_v8 = vadd.f32 %v427_v7, %v355_v6 }
 0x10b   : > { %v429_v9 = vpop.f32.mrf.mxu1 }
 0x10c   : > { %v1572_v10 = vmax.f32 %v428_v8, 0.0  ;;  %v430_v11 = vadd.f32 %v429_v9, %v355_v6  ;;  %v1692_v9 = vld [vmem:[#allocation7 + $0x18] sm:$0xff] }
 0x10e   : > { %478 = vrot.lane.b32.xlu1 %v1572_v10, %s1400_s25  ;;  %485 = vrot.lane.b32.xlu0 %v1572_v10, %s1401_s12  ;;  %v1578_v12 = vmax.f32 %v430_v11, 0.0  ;;  %v518_v63 = vmul.f32 %v1666_v54, %v1572_v10 }
 0x110   : > { %v519_v60 = vmul.f32 %v1662_v50, %v1578_v12 }
 0x112   : > { %471 = vrot.lane.b32.xlu1 %v1572_v10, %s1402_s13  ;;  %480 = vrot.lane.b32.xlu0 %v1578_v12, %s1400_s25 }
 0x116   : > { %464 = vrot.lane.b32.xlu1 %v1572_v10, %s1403_s18  ;;  %473 = vrot.lane.b32.xlu0 %v1578_v12, %s1402_s13 }
 0x11a   : > { %487 = vrot.lane.b32.xlu1 %v1578_v12, %s1401_s12  ;;  %466 = vrot.lane.b32.xlu0 %v1578_v12, %s1403_s18 }
 0x11e   : > { %457 = vrot.lane.b32.xlu1 %v1572_v10, %s1404_s17  ;;  %459 = vrot.lane.b32.xlu0 %v1578_v12, %s1404_s17 }
 0x122   : > { %450 = vrot.lane.b32.xlu1 %v1572_v10, %s1859_s20  ;;  %452 = vrot.lane.b32.xlu0 %v1578_v12, %s1859_s20 }
 0x126   : > { %443 = vrot.lane.b32.xlu1 %v1572_v10, %s1406_s22  ;;  %445 = vrot.lane.b32.xlu0 %v1578_v12, %s1406_s22 }
 0x12a   : > { %434 = vrot.lane.b32.xlu1 %v1572_v10, %s1407_s24  ;;  %436 = vrot.lane.b32.xlu0 %v1578_v12, %s1407_s24  ;;  %v1697_v12 = vld [vmem:[#allocation7 + $0x10] sm:$0xff] }
 0x12e   : > { %616 = vperm.xlu0 %1241, %v613_v13   ;;  %532 = vperm.xlu1 %1242, %v529_v14  }
 0x132   : > { %703 = vperm.xlu1 %1242, %v1144_v15   ;;  %v1703_v15 = vld [vmem:[#allocation7] sm:$0xff] }
 0x180   : > { %v479_v16 = vpop.permute.xlu1 %478  ;;  %v486_v17 = vpop.permute.xlu0 %485 }
 0x184   : > { %v472_v19 = vpop.permute.xlu1 %471  ;;  %v481_v20 = vpop.permute.xlu0 %480 }
 0x185   : > { %v484_v29 = vsel %vm482_vm1, %v481_v20, %v479_v16  ;;  %v483_v33 = vsel %vm482_vm1, %v479_v16, %v481_v20  ;;  %v1705_v16 = vld [vmem:[#allocation7 + $0x8] sm:$0xff] }
 0x186   : > { %v525_v38 = vmul.f32 %v1626_v28, %v484_v29  ;;  %v524_v43 = vmul.f32 %v1634_v32, %v483_v33  ;;  %v528_v29 = vld [vmem:[#allocation2] sm:$0xff] }
 0x188   : > { %v465_v22 = vpop.permute.xlu1 %464  ;;  %v474_v23 = vpop.permute.xlu0 %473 }
 0x189   : > { %v477_v37 = vsel %vm475_vm3, %v474_v23, %v472_v19  ;;  %v476_v40 = vsel %vm475_vm3, %v472_v19, %v474_v23 }
 0x18a   : > { %v523_v46 = vmul.f32 %v1641_v36, %v477_v37  ;;  %v522_v49 = vmul.f32 %v1646_v39, %v476_v40  ;;  %v612_v40 = vld [vmem:[#allocation5] sm:$0xff] }
 0x18c   : > { %v488_v26 = vpop.permute.xlu1 %487  ;;  %v467_v27 = vpop.permute.xlu0 %466 }
 0x18d   : > { %v490_v30 = vsel %vm489_vm2, %v486_v17, %v488_v26  ;;  %v491_v31 = vsel %vm489_vm2, %v488_v26, %v486_v17  ;;  %v470_v45 = vsel %vm468_vm4, %v467_v27, %v465_v22  ;;  %v469_v48 = vsel %vm468_vm4, %v465_v22, %v467_v27 }
 0x18e   : > { %v526_v34 = vmul.f32 %v1621_v24, %v490_v30  ;;  %v527_v35 = vmul.f32 %v1623_v25, %v491_v31  ;;  %v521_v51 = vmul.f32 %v1651_v44, %v470_v45  ;;  %v520_v55 = vmul.f32 %v1656_v47, %v469_v48 }
 0x190   : > { %v458_v41 = vpop.permute.xlu1 %457  ;;  %553 = vmatprep.subr.mxu1 %v527_v35  ;;  %v460_v42 = vpop.permute.xlu0 %459 }
 0x191   : > { %554 = vmatpush1.msra.mxu1 %v526_v34  ;;  %v462_v57 = vsel %vm461_vm5, %v458_v41, %v460_v42  ;;  %v463_v59 = vsel %vm461_vm5, %v460_v42, %v458_v41 }
 0x192   : > { %555 = vmatprep.subr.mxu1 %v525_v38  ;;  %v517_v1 = vmul.f32 %v1669_v56, %v462_v57  ;;  %v516_v8 = vmul.f32 %v1673_v58, %v463_v59 }
 0x193   : > { %556 = vmatpush1.msra.mxu1 %v524_v43 }
 0x194   : > { %v451_v52 = vpop.permute.xlu1 %450  ;;  %557 = vmatprep.subr.mxu1 %v523_v46  ;;  %v453_v53 = vpop.permute.xlu0 %452 }
 0x195   : > { %558 = vmatpush1.msra.mxu1 %v522_v49  ;;  %v455_v62 = vsel %vm454_vm6, %v451_v52, %v453_v53  ;;  %v456_v5 = vsel %vm454_vm6, %v453_v53, %v451_v52  ;;  %v1143_v53 = vld [vmem:[%s1849_s1 + $0x8] sm:$0xff] }
 0x196   : > { %559 = vmatprep.subr.mxu1 %v521_v51  ;;  %v515_v10 = vmul.f32 %v1680_v61, %v455_v62  ;;  %v514_v14 = vmul.f32 %v1687_v4, %v456_v5 }
 0x197   : > { %560 = vmatpush1.msra.mxu1 %v520_v55 }
 0x198   : > { %v444_v6 = vpop.permute.xlu1 %443  ;;  %561 = vmatprep.subr.mxu1 %v519_v60  ;;  %v446_v7 = vpop.permute.xlu0 %445 }
 0x199   : > { %v448_v11 = vsel %vm447_vm7, %v444_v6, %v446_v7  ;;  %562 = vmatpush1.msra.mxu1 %v518_v63  ;;  %v449_v13 = vsel %vm447_vm7, %v446_v7, %v444_v6  ;;  %v1148_v63 = vld [vmem:[%s1854_s6 + $0x8] sm:$0xff] }
 0x19a   : > { %563 = vmatprep.subr.mxu1 %v517_v1  ;;  %v513_v17 = vmul.f32 %v1692_v9, %v448_v11  ;;  %v512_v20 = vmul.f32 %v1697_v12, %v449_v13 }
 0x19b   : > { %564 = vmatpush1.msra.mxu1 %v516_v8 }
 0x19c   : > { %v435_v18 = vpop.permute.xlu1 %434  ;;  %v437_v19 = vpop.permute.xlu0 %436  ;;  %565 = vmatprep.subr.mxu1 %v515_v10 }
 0x19d   : > { %v441_v22 = vsel %vm440_vm8, %v435_v18, %v437_v19  ;;  %v442_v23 = vsel %vm440_vm8, %v437_v19, %v435_v18  ;;  %566 = vmatpush1.msra.mxu1 %v514_v14 }
 0x19e   : > { %v510_v26 = vmul.f32 %v1703_v15, %v442_v23  ;;  %v511_v27 = vmul.f32 %v1705_v16, %v441_v22  ;;  %567 = vmatprep.subr.mxu1 %v513_v17 }
 0x19f   : > { %568 = vmatpush1.msra.mxu1 %v512_v20 }
 0x1a0   : > { %569 = vmatprep.subr.mxu1 %v511_v27 }
 0x1a1   : > { %570 = vmatpush1.msra.mxu1 %v510_v26 }
 0x1a2   : > { %1141 = vmatmul.mubr.msk.f32.vlgmr.msra.gmra.mxu1 %vm535_vm9, %v528_v29 }
 0x1a3   : > { %1009 = vmatprep.mubr.f32.mxu1 %v1398_v0 }
 0x1a9   : > { %v533_v31 = vpop.permute.xlu1 %532  ;;  %v617_v41 = vpop.permute.xlu0 %616 }
 0x262   : > { %v605_v30 = vpop.f32.mrf.mxu1 }
 0x263   : > { %v606_v33 = vadd.f32 %v605_v30, %v533_v31 }
 0x264   : > { %v607_v34 = vpop.f32.mrf.mxu1 }
 0x265   : > { %v608_v35 = vadd.f32 %v607_v34, %v533_v31  ;;  %v610_v38 = vmax.f32 %v606_v33, 0.0 }
 0x267   : > { %v611_v37 = vmax.f32 %v608_v35, 0.0 }
 0x269   : > { %652 = vmatprep.subr.mxu0 %v611_v37 }
 0x26a   : > { %653 = vmatpush1.msra.mxu0 %v610_v38 }
 0x26b   : > { %1142 = vmatmul.mubr.msk.f32.vlgmr.msra.gmra.mxu0 %vm357_vm0, %v612_v40 }
 0x26c   : > { %773 = vmatprep.mubr.f32.mxu0 %v1398_v0 }
 0x32b   : > { %v688_v42 = vpop.f32.mrf.mxu0 }
 0x32c   : > { %v689_v43 = vadd.f32 %v688_v42, %v617_v41 }
 0x32d   : > { %v690_v45 = vpop.f32.mrf.mxu0 }
 0x32e   : > { %v691_v46 = vadd.f32 %v690_v45, %v617_v41  ;;  %v1720_v48 = vadd.f32 %v689_v43, %v1560_v3 }
 0x330   : > { %v1723_v49 = vadd.f32 %v691_v46, %v1558_v2  ;;  %v695_v52 = vmax.f32 %v1720_v48, 0.0  ;;  %v704_v2 = vpop.permute.xlu1 %703 }
 0x332   : > { %v696_v51 = vmax.f32 %v1723_v49, 0.0 }
 0x334   : > { %739 = vmatprep.subr.mxu0 %v696_v51 }
 0x335   : > { %740 = vmatpush1.msra.mxu0 %v695_v52 }
 0x336   : > { %1145 = vmatmul.mubr.msk.f32.vlgmr.msra.gmra.mxu0 %vm357_vm0, %v1143_v53 }
 0x337   : > { %924 = vmatprep.mubr.f32.mxu0 %v1398_v0  ;;  %v1146_v0 = vld [vmem:[%s1852_s4 + $0x8] sm:$0xff] }
 0x3f6   : > { %v775_v3 = vpop.f32.mrf.mxu0 }
 0x3f7   : > { %v776_v55 = vadd.f32 %v775_v3, %v704_v2 }
 0x3f8   : > { %v777_v57 = vpop.f32.mrf.mxu0 }
 0x3f9   : > { %v780_v59 = vmax.f32 %v776_v55, 0.0  ;;  %v778_v60 = vadd.f32 %v777_v57, %v704_v2 }
 0x3fb   : > { %v781_v62 = vmax.f32 %v778_v60, 0.0  ;;  %824 = vrot.lane.b32.xlu0 %v780_v59, %s1401_s12  ;;  %v838_v37 = vmul.f32 %v780_v59, %v1666_v54 }
 0x3fd   : > { %826 = vrot.lane.b32.xlu1 %v781_v62, %s1401_s12 }
 0x3ff   : > { %818 = vrot.lane.b32.xlu0 %v780_v59, %s1400_s25 }
 0x401   : > { %820 = vrot.lane.b32.xlu1 %v781_v62, %s1400_s25 }
 0x403   : > { %812 = vrot.lane.b32.xlu0 %v780_v59, %s1402_s13 }
 0x405   : > { %814 = vrot.lane.b32.xlu1 %v781_v62, %s1402_s13 }
 0x407   : > { %806 = vrot.lane.b32.xlu0 %v780_v59, %s1403_s18 }
 0x409   : > { %808 = vrot.lane.b32.xlu1 %v781_v62, %s1403_s18 }
 0x40b   : > { %800 = vrot.lane.b32.xlu0 %v780_v59, %s1404_s17 }
 0x40d   : > { %802 = vrot.lane.b32.xlu1 %v781_v62, %s1404_s17  ;;  %s340_s17 = sand.u32 1, %s1381_s28  }
 0x40f   : > { %794 = vrot.lane.b32.xlu0 %v780_v59, %s1869_s10 }
 0x411   : > { %796 = vrot.lane.b32.xlu1 %v781_v62, %s1869_s10  ;;  %s1023_s10 = scalar_lea.sflag [#allocation4], %s340_s17 }
 0x413   : > { %788 = vrot.lane.b32.xlu0 %v780_v59, %s1406_s22 }
 0x415   : > { %790 = vrot.lane.b32.xlu1 %v781_v62, %s1406_s22  ;;  %s1137_s22 = sshll.u32 %s340_s17, 4 }
 0x416   : > { %s342_s21 = scalar_lea.vmem [#allocation8], %s1137_s22 }
 0x417   : > { %782 = vrot.lane.b32.xlu0 %v780_v59, %s1407_s24  ;;  %v849_v59 = vld [vmem:[#allocation2 + $0x8] sm:$0xff]  ;;  %s1037_s23 = sshll.u32 %s342_s21, 4  ;;  %s1038_s23 = int_to_ptr.vmem [resolvable:$true] %s1037_s23 }
 0x418   : > { %s1321_s25 = scalar_lea.vmem %s1038_s23, 256 }
 0x419   : > { %784 = vrot.lane.b32.xlu1 %v781_v62, %s1407_s24  ;;  %s1156_s24 = sshll.u32 %s1475_s9, 8  ;;  %p1322_p10 = scmp.ne.s32.totalorder %s1038_s23, %s1321_s25 }
 0x41a   : > { %s1035_s26 = scalar_lea.hbm %s1856_s8, %s1156_s24  ;;  %s1408_s9 = smov [#allocation8]  }
 0x41b   : > { %854 = vperm.xlu0 %1241, %v1146_v0   ;;  %p1323_p2 = pnand %p1322_p10, %p1870_p12  ;;  %s1325_s12 = sshll.u32 %s1408_s9, 4  ;;  %s1326_s12 = int_to_ptr.vmem [resolvable:$false] %s1325_s12 }
 0x41c   : > { %s1327_s13 = scalar_lea.vmem %s1326_s12, 512  ;;  %p1328_p7 = scmp.lt.s32.totalorder %s1038_s23, %s1326_s12 }
 0x41d   : > { %939 = vperm.xlu1 %1242, %v1148_v63   ;;  %p1324_p4 = pneg %p1323_p2  ;;  %p1329_p8 = scmp.lt.s32.totalorder %s1327_s13, %s1321_s25 }
 0x41f   : > { %p1330_p11 = por %p1329_p8, %p1328_p7 }
 0x421   : > { %p1331_p0 = pnand %p1330_p11, %p1324_p4 }
 0x46d   : > { %v825_v1 = vpop.permute.xlu0 %824 }
 0x46f   : > { %v827_v5 = vpop.permute.xlu1 %826 }
 0x470   : > { %v828_v6 = vsel %vm489_vm2, %v825_v1, %v827_v5  ;;  %v829_v7 = vsel %vm489_vm2, %v827_v5, %v825_v1  ;;  %v934_v1 = vld [vmem:[#allocation5 + $0x8] sm:$0xff] }
 0x471   : > { %v846_v8 = vmul.f32 %v828_v6, %v1621_v24  ;;  %v847_v11 = vmul.f32 %v829_v7, %v1623_v25  ;;  %v819_v10 = vpop.permute.xlu0 %818 }
 0x473   : > { %v821_v13 = vpop.permute.xlu1 %820  ;;  %874 = vmatprep.subr.mxu0 %v847_v11 }
 0x474   : > { %v822_v14 = vsel %vm482_vm1, %v819_v10, %v821_v13  ;;  %v823_v17 = vsel %vm482_vm1, %v821_v13, %v819_v10  ;;  %875 = vmatpush1.msra.mxu0 %v846_v8 }
 0x475   : > { %v844_v18 = vmul.f32 %v822_v14, %v1634_v32  ;;  %v845_v19 = vmul.f32 %v823_v17, %v1626_v28  ;;  %v813_v20 = vpop.permute.xlu0 %812 }
 0x477   : > { %v815_v22 = vpop.permute.xlu1 %814  ;;  %876 = vmatprep.subr.mxu0 %v845_v19 }
 0x478   : > { %v816_v24 = vsel %vm475_vm3, %v813_v20, %v815_v22  ;;  %v817_v25 = vsel %vm475_vm3, %v815_v22, %v813_v20  ;;  %877 = vmatpush1.msra.mxu0 %v844_v18 }
 0x479   : > { %v842_v23 = vmul.f32 %v816_v24, %v1646_v39  ;;  %v843_v26 = vmul.f32 %v817_v25, %v1641_v36  ;;  %v807_v27 = vpop.permute.xlu0 %806  ;;  %v839_v39 = vmul.f32 %v781_v62, %v1662_v50 }
 0x47b   : > { %v809_v29 = vpop.permute.xlu1 %808  ;;  %878 = vmatprep.subr.mxu0 %v843_v26 }
 0x47c   : > { %v810_v28 = vsel %vm468_vm4, %v807_v27, %v809_v29  ;;  %v811_v32 = vsel %vm468_vm4, %v809_v29, %v807_v27  ;;  %879 = vmatpush1.msra.mxu0 %v842_v23 }
 0x47d   : > { %v840_v30 = vmul.f32 %v810_v28, %v1656_v47  ;;  %v841_v31 = vmul.f32 %v811_v32, %v1651_v44  ;;  %v801_v33 = vpop.permute.xlu0 %800 }
 0x47f   : > { %v803_v34 = vpop.permute.xlu1 %802  ;;  %880 = vmatprep.subr.mxu0 %v841_v31 }
 0x480   : > { %v804_v36 = vsel %vm461_vm5, %v801_v33, %v803_v34  ;;  %v805_v35 = vsel %vm461_vm5, %v803_v34, %v801_v33  ;;  %881 = vmatpush1.msra.mxu0 %v840_v30 }
 0x481   : > { %v836_v38 = vmul.f32 %v805_v35, %v1673_v58  ;;  %v837_v47 = vmul.f32 %v804_v36, %v1669_v56  ;;  %882 = vmatprep.subr.mxu0 %v839_v39  ;;  %v795_v44 = vpop.permute.xlu0 %794 }
 0x482   : > { %883 = vmatpush1.msra.mxu0 %v838_v37 }
 0x483   : > { %v797_v40 = vpop.permute.xlu1 %796  ;;  %884 = vmatprep.subr.mxu0 %v837_v47 }
 0x484   : > { %v798_v50 = vsel %vm454_vm6, %v795_v44, %v797_v40  ;;  %v799_v41 = vsel %vm454_vm6, %v797_v40, %v795_v44  ;;  %885 = vmatpush1.msra.mxu0 %v836_v38 }
 0x485   : > { %v834_v42 = vmul.f32 %v799_v41, %v1687_v4  ;;  %v835_v54 = vmul.f32 %v798_v50, %v1680_v61  ;;  %v789_v43 = vpop.permute.xlu0 %788 }
 0x487   : > { %v791_v58 = vpop.permute.xlu1 %790  ;;  %886 = vmatprep.subr.mxu0 %v835_v54 }
 0x488   : > { %v792_v56 = vsel %vm447_vm7, %v789_v43, %v791_v58  ;;  %v793_v45 = vsel %vm447_vm7, %v791_v58, %v789_v43  ;;  %887 = vmatpush1.msra.mxu0 %v834_v42 }
 0x489   : > { %v832_v46 = vmul.f32 %v793_v45, %v1697_v12  ;;  %v833_v53 = vmul.f32 %v792_v56, %v1692_v9  ;;  %v783_v2 = vpop.permute.xlu0 %782 }
 0x48b   : > { %v785_v3 = vpop.permute.xlu1 %784  ;;  %888 = vmatprep.subr.mxu0 %v833_v53 }
 0x48c   : > { %v786_v61 = vsel %vm440_vm8, %v783_v2, %v785_v3  ;;  %v787_v4 = vsel %vm440_vm8, %v785_v3, %v783_v2  ;;  %889 = vmatpush1.msra.mxu0 %v832_v46 }
 0x48d   : > { %v830_v55 = vmul.f32 %v787_v4, %v1703_v15  ;;  %v831_v57 = vmul.f32 %v786_v61, %v1705_v16 }
 0x48f   : > { %890 = vmatprep.subr.mxu0 %v831_v57 }
 0x490   : > { %891 = vmatpush1.msra.mxu0 %v830_v55 }
 0x491   : > { %1147 = vmatmul.mubr.msk.f32.vlgmr.msra.gmra.mxu0 %vm535_vm9, %v849_v59 }
 0x496   : > { %v855_v12 = vpop.permute.xlu0 %854 }
 0x498   : > { %v940_v15 = vpop.permute.xlu1 %939 }
 0x551   : > { %v926_v9 = vpop.f32.mrf.mxu0 }
 0x552   : > { %v927_v60 = vadd.f32 %v926_v9, %v855_v12 }
 0x553   : > { %v928_v62 = vpop.f32.mrf.mxu0 }
 0x554   : > { %v929_v0 = vadd.f32 %v928_v62, %v855_v12  ;;  %v931_v21 = vmax.f32 %v927_v60, 0.0 }
 0x556   : > { %v932_v63 = vmax.f32 %v929_v0, 0.0 }
 0x558   : > { %975 = vmatprep.subr.mxu1 %v932_v63 }
 0x559   : > { %976 = vmatpush1.msra.mxu1 %v931_v21 }
 0x55a   : > { %1149 = vmatmul.mubr.msk.f32.vlgmr.msra.gmra.mxu1 %vm357_vm0, %v934_v1 }
 0x61a   : > { %v1011_v16 = vpop.f32.mrf.mxu1 }
 0x61b   : > { %v1012_v5 = vadd.f32 %v1011_v16, %v940_v15 }
 0x61c   : > { %v1013_v6 = vpop.f32.mrf.mxu1 }
 0x61d   : > { %v1016_v7 = vadd.f32 %v1012_v5, %v695_v52  ;;  %v1014_v8 = vadd.f32 %v1013_v6, %v940_v15 }
 0x61f   : > { %v1018_v11 = vmax.f32 %v1016_v7, 0.0  ;;  %v1017_v10 = vadd.f32 %v1014_v8, %v696_v51 }
 0x621   : > { %1020 = vst [vmem:[%s342_s21] sm:$0xff] %v1018_v11  ;;  %v1019_v13 = vmax.f32 %v1017_v10, 0.0 }
 0x623   : > { %1021 = vst [vmem:[%s342_s21 + $0x8] sm:$0xff] %v1019_v13 }
 0x624   : > { %1334 = shalt.err (!%p1331_p0)
}
 0x625   : > { %s1335_s18 = scalar_lea.hbm %s1035_s26, 256  ;;  %s1339_s24 = scalar_lea.hbm %s1856_s8, 512 }
 0x626   : > { %p1336_p6 = scmp.ne.s32.totalorder %s1035_s26, %s1335_s18  ;;  %p1340_p5 = scmp.lt.s32.totalorder %s1035_s26, %s1856_s8 }
 0x627   : > { %p1341_p1 = scmp.lt.s32.totalorder %s1339_s24, %s1335_s18 }
 0x628   : > { %p1337_p9 = pnand %p1336_p6, %p1870_p12 }
 0x629   : > { %p1342_p3 = por %p1341_p1, %p1340_p5 }
 0x62a   : > { %p1338_p13 = pneg %p1337_p9 }
 0x62c   : > { %p1343_p10 = pnand %p1342_p3, %p1338_p13 }
 0x62e   : > { %1346 = shalt.err (!%p1343_p10)
}
 0x62f   : > { %1169 = dma.vmem_to_hbm [thread:$0]  (%p1870_p12), %s1038_s23, 256, %s1035_s26, %s1023_s10  }
 0x630 PF: > { %p1191_p2 = scmp.ge.s32.totalorder %s1389_s30, 2  ;;  %s1049_s20 = sand.u32 1, %s1377_s27  }
 0x631   : > { %p1871_p4 = scmp.ne.s32.totalorder %s1862_s16, 0  ;;  %s1050_s25 = scalar_lea.sflag [#allocation4], %s1049_s20 }
 0x633   : > { %p1182_p7 = pnand %p1191_p2, %p1871_p4 }
 0x635   : > { %p1183_p8 = pneg %p1182_p7 }
 0x637   : > { %1372 = dma.done.wait (%p1183_p8), %s1050_s25, 256  }
 0x638   : > { %1374 = vsyncadd (%p1183_p8), %s1050_s25, 4294967040  ;;  %p20_p11 = scmp.ge.s32.totalorder %s1479_s11, 4   ;;  %s1872_s27 = smov %s1381_s28 }
 0x639   : > { %s1873_s28 = smov %s1385_s29  ;;  %s1874_s29 = smov %s1490_s14 }
 0x63a   : > { %s1875_s30 = smov %s1479_s11  ;;  %22 = sbr.rel (!%p20_p11) target bundleno = 5 (0x5), region = 106 }
 0x63f   :  { %1055 = vsyncpa [#allocation3], 1 }
 0x640   :  { %1057 = vsyncpa [#allocation3 + $0x1], 1 }
 0x641   :  { %1058 = vsyncpa [#allocation6], 1 }
 0x642   :  { %1059 = vsyncpa [#allocation4], 1 }
 0x643   :  { %1061 = vsyncpa [#allocation4 + $0x1], 1 }

</bundles_post_ra>
